<compile_context>
chip_gen: v6e
topology: v6e:2x2x1
jax: 0.10.0
libtpu: 0.0.40
codegen_flags: <defaults>
</compile_context>

<pallas_src>
import jax
import jax.numpy as jnp
from jax.experimental import pallas as pl
from jax.experimental.pallas import tpu as pltpu

N_LOC = 10     # number of location bins per axis (fixed by the torch module)
LANE = 128     # TPU lane width; all slabs are padded to 128 lanes


# ----------------------------------------------------------------------------
# Kernel
# ----------------------------------------------------------------------------
def _location_head_kernel(x_ref, w_ref, b_ref, g_ref, out_ref):
    d_in = x_ref.shape[1]          # static
    lane = out_ref.shape[1] // 2   # 128

    x = x_ref[...]                 # (B, d_in) f32
    b = b_ref[...]                 # (8, 128)  f32 : rows 0/1/2 = fused b1/b2/b3
    g = g_ref[...]                 # (B, 128)  f32 : iid Gumbel(0,1) noise

    # Fused 3-layer MLP for both branches.  MXU operands in bf16 (native on
    # v6e/v7x, supported on v5e), f32 accumulation, f32 bias/ReLU.
    h = jnp.dot(x.astype(jnp.bfloat16), w_ref[0:d_in, :],
                preferred_element_type=jnp.float32) + b[0:1, :]
    h = jnp.maximum(h, 0.0)
    h = jnp.dot(h.astype(jnp.bfloat16), w_ref[d_in:d_in + lane, :],
                preferred_element_type=jnp.float32) + b[1:2, :]
    h = jnp.maximum(h, 0.0)
    logits = jnp.dot(h.astype(jnp.bfloat16), w_ref[d_in + lane:d_in + 2 * lane, :],
                     preferred_element_type=jnp.float32) + b[2:3, :]
    # logits: (B, 128); cols [0,10) = x logits, [10,20) = y logits, rest 0.

    col = jax.lax.broadcasted_iota(jnp.int32, logits.shape, 1)
    x_mask = col < N_LOC
    y_mask = (col >= N_LOC) & (col < 2 * N_LOC)
    neg_inf = jnp.float32(float("-inf"))

    # Masked softmax in fused lane space: no lane shuffles, probs land exactly
    # where their logits sit (x at cols [0,10), y at cols [10,20)).
    def masked_softmax(mask):
        z = jnp.where(mask, logits, neg_inf)
        m = jnp.max(z, axis=-1, keepdims=True)
        e = jnp.exp(z - m)                             # 0 outside the mask
        return e / jnp.sum(e, axis=-1, keepdims=True)

    probs = masked_softmax(x_mask) + masked_softmax(y_mask)   # (B, 128)

    # Gumbel-max categorical sample == torch.multinomial(softmax(logits), 1).
    zg = logits + g

    def masked_argmax(mask):
        z = jnp.where(mask, zg, neg_inf)
        m = jnp.max(z, axis=-1, keepdims=True)
        # argmax via masked-min over column indices (ties -> lowest index).
        return jnp.min(jnp.where(z >= m, col, 2 * lane),
                       axis=-1, keepdims=True)          # (B, 1) int32

    x_id = masked_argmax(x_mask)                        # in [0, 10)
    y_id = masked_argmax(y_mask) - N_LOC                # in [0, 10)

    # First 128 lanes: logits with the sampled ids (as f32) at cols 20 / 21.
    half0 = jnp.where(col == 2 * N_LOC, x_id.astype(jnp.float32),
                      jnp.where(col == 2 * N_LOC + 1, y_id.astype(jnp.float32),
                                logits))
    out_ref[:, 0:lane] = half0
    out_ref[:, lane:2 * lane] = probs


# ----------------------------------------------------------------------------
# Parameter construction / packing (host side, done once)
# ----------------------------------------------------------------------------
def init_params(key, d_in=64, d_h1=48, d_h2=32, n_loc=N_LOC):
    """Per-layer params.  Weights stored (in, out) == torch's W.T; biases (out,)."""
    dims = [(d_in, d_h1), (d_h1, d_h2), (d_h2, n_loc)]
    params = {}
    for branch in ("x", "y"):
        for i, (fan_in, fan_out) in enumerate(dims, start=1):
            key, kw, kb = jax.random.split(key, 3)
            bound = 1.0 / jnp.sqrt(float(fan_in))
            params[f"w{branch}{i}"] = jax.random.uniform(
                kw, (fan_in, fan_out), jnp.float32, -bound, bound)
            params[f"b{branch}{i}"] = jax.random.uniform(
                kb, (fan_out,), jnp.float32, -bound, bound)
    return params


def pack_params(params, d_in=64, d_h1=48, d_h2=32, n_loc=N_LOC):
    """Pack the 12 tensors into one bf16 weight slab + one f32 bias slab.

    Weight slab rows: [0, d_in)          fused layer-1  [wx1 | wy1 | 0]
                      [d_in, d_in+128)   block-diag layer-2 (wx2 / wy2)
                      [d_in+128, +256)   block-diag layer-3 (wx3 / wy3)
    Requires d_in % 16 == 0 (bf16 sublane tile) and 2*d_h1, 2*d_h2, 2*n_loc <= 128.
    """
    assert d_in % 16 == 0 and 2 * d_h1 <= LANE and 2 * d_h2 <= LANE and 2 * n_loc <= LANE
    f32 = jnp.float32

    w1 = jnp.zeros((d_in, LANE), f32)
    w1 = w1.at[:, 0:d_h1].set(params["wx1"]).at[:, d_h1:2 * d_h1].set(params["wy1"])

    w2 = jnp.zeros((LANE, LANE), f32)
    w2 = w2.at[0:d_h1, 0:d_h2].set(params["wx2"])
    w2 = w2.at[d_h1:2 * d_h1, d_h2:2 * d_h2].set(params["wy2"])

    w3 = jnp.zeros((LANE, LANE), f32)
    w3 = w3.at[0:d_h2, 0:n_loc].set(params["wx3"])
    w3 = w3.at[d_h2:2 * d_h2, n_loc:2 * n_loc].set(params["wy3"])

    w_slab = jnp.concatenate([w1, w2, w3], axis=0).astype(jnp.bfloat16)

    b_slab = jnp.zeros((8, LANE), f32)
    b_slab = b_slab.at[0, 0:d_h1].set(params["bx1"]).at[0, d_h1:2 * d_h1].set(params["by1"])
    b_slab = b_slab.at[1, 0:d_h2].set(params["bx2"]).at[1, d_h2:2 * d_h2].set(params["by2"])
    b_slab = b_slab.at[2, 0:n_loc].set(params["bx3"]).at[2, n_loc:2 * n_loc].set(params["by3"])
    return w_slab, b_slab


# ----------------------------------------------------------------------------
# Wrapper
# ----------------------------------------------------------------------------
@jax.jit
def location_head(x, w_slab, b_slab, key):
    B = x.shape[0]
    gumbel = jax.random.gumbel(key, (B, LANE), jnp.float32)

    vmem = pl.BlockSpec(memory_space=pltpu.MemorySpace.VMEM)
    out = pl.pallas_call(
        _location_head_kernel,
        out_shape=jax.ShapeDtypeStruct((B, 2 * LANE), jnp.float32),
        in_specs=[vmem, vmem, vmem, vmem],
        out_specs=vmem,
    )(x, w_slab, b_slab, gumbel)

    x_logits = out[:, 0:N_LOC]
    y_logits = out[:, N_LOC:2 * N_LOC]
    x_id = out[:, 2 * N_LOC:2 * N_LOC + 1].astype(jnp.int32)       # exact small ints
    y_id = out[:, 2 * N_LOC + 1:2 * N_LOC + 2].astype(jnp.int32)
    x_probs = out[:, LANE:LANE + N_LOC]
    y_probs = out[:, LANE + N_LOC:LANE + 2 * N_LOC]
    return x_logits, x_probs, x_id, y_logits, y_probs, y_id


if __name__ == "__main__":
    key = jax.random.PRNGKey(0)
    k_param, k_input, k_sample = jax.random.split(key, 3)

    B, D_IN, D_H1, D_H2 = 8, 64, 48, 32
    params = init_params(k_param, d_in=D_IN, d_h1=D_H1, d_h2=D_H2, n_loc=N_LOC)
    w_slab, b_slab = pack_params(params, d_in=D_IN, d_h1=D_H1, d_h2=D_H2, n_loc=N_LOC)
    x = jax.random.normal(k_input, (B, D_IN), jnp.float32)

    outs = jax.block_until_ready(location_head(x, w_slab, b_slab, k_sample))
    x_logits, x_probs, x_id, y_logits, y_probs, y_id = outs

    assert x_logits.shape == (B, N_LOC) and y_logits.shape == (B, N_LOC)
    assert x_probs.shape == (B, N_LOC) and y_probs.shape == (B, N_LOC)
    assert x_id.shape == (B, 1) and y_id.shape == (B, 1)
    assert bool(jnp.allclose(jnp.sum(x_probs, axis=-1), 1.0, atol=1e-4))
    assert bool(jnp.allclose(jnp.sum(y_probs, axis=-1), 1.0, atol=1e-4))
    assert bool(jnp.all((x_id >= 0) & (x_id < N_LOC)))
    assert bool(jnp.all((y_id >= 0) & (y_id < N_LOC)))

    print("KERNEL_OK")
</pallas_src>

<mosaic_0001>
module attributes {stable_mosaic.version = 11 : i64} {
  func.func @_location_head_kernel(%arg0: memref<8x64xf32, #tpu.memory_space<vmem>>, %arg1: memref<320x128xbf16, #tpu.memory_space<vmem>>, %arg2: memref<8x128xf32, #tpu.memory_space<vmem>>, %arg3: memref<8x128xf32, #tpu.memory_space<vmem>>, %arg4: memref<8x256xf32, #tpu.memory_space<vmem>>) attributes {dimension_semantics = [], scalar_prefetch = 0 : i64, scratch_operands = 0 : i64, tpu.core_type = #tpu.core_type<tc>} {
    %c0 = arith.constant 0 : index
    %c0_0 = arith.constant 0 : index
    %0 = vector.load %arg0[%c0, %c0_0] : memref<8x64xf32, #tpu.memory_space<vmem>>, vector<8x64xf32>
    %c0_1 = arith.constant 0 : index
    %c0_2 = arith.constant 0 : index
    %1 = vector.load %arg2[%c0_1, %c0_2] : memref<8x128xf32, #tpu.memory_space<vmem>>, vector<8x128xf32>
    %c0_3 = arith.constant 0 : index
    %c0_4 = arith.constant 0 : index
    %2 = vector.load %arg3[%c0_3, %c0_4] : memref<8x128xf32, #tpu.memory_space<vmem>>, vector<8x128xf32>
    %3 = arith.truncf %0 : vector<8x64xf32> to vector<8x64xbf16>
    %c0_5 = arith.constant 0 : index
    %c0_6 = arith.constant 0 : index
    %4 = vector.load %arg1[%c0_5, %c0_6] : memref<320x128xbf16, #tpu.memory_space<vmem>>, vector<64x128xbf16>
    %cst = arith.constant dense<0.000000e+00> : vector<8x128xf32>
    %5 = tpu.matmul %3, %4, %cst {dimension_numbers = #tpu.dot_dimension_numbers<[1], [0], [0], [1], [0, 0, 1, 1], [], []>} : vector<8x64xbf16>, vector<64x128xbf16>, vector<8x128xf32> -> vector<8x128xf32>
    %6 = vector.extract_strided_slice %1 {offsets = [0, 0], sizes = [1, 128], strides = [1, 1]} : vector<8x128xf32> to vector<1x128xf32>
    %7 = vector.broadcast %6 : vector<1x128xf32> to vector<8x128xf32>
    %8 = arith.addf %5, %7 : vector<8x128xf32>
    %cst_7 = arith.constant 0.000000e+00 : f32
    %9 = vector.broadcast %cst_7 : f32 to vector<8x128xf32>
    %10 = arith.maximumf %8, %9 : vector<8x128xf32>
    %11 = arith.truncf %10 : vector<8x128xf32> to vector<8x128xbf16>
    %c64 = arith.constant 64 : index
    %c0_8 = arith.constant 0 : index
    %12 = vector.load %arg1[%c64, %c0_8] : memref<320x128xbf16, #tpu.memory_space<vmem>>, vector<128x128xbf16>
    %cst_9 = arith.constant dense<0.000000e+00> : vector<8x128xf32>
    %13 = tpu.matmul %11, %12, %cst_9 {dimension_numbers = #tpu.dot_dimension_numbers<[1], [0], [0], [1], [0, 0, 1, 1], [], []>} : vector<8x128xbf16>, vector<128x128xbf16>, vector<8x128xf32> -> vector<8x128xf32>
    %14 = vector.extract_strided_slice %1 {offsets = [1, 0], sizes = [1, 128], strides = [1, 1]} : vector<8x128xf32> to vector<1x128xf32>
    %15 = vector.broadcast %14 : vector<1x128xf32> to vector<8x128xf32>
    %16 = arith.addf %13, %15 : vector<8x128xf32>
    %cst_10 = arith.constant 0.000000e+00 : f32
    %17 = vector.broadcast %cst_10 : f32 to vector<8x128xf32>
    %18 = arith.maximumf %16, %17 : vector<8x128xf32>
    %19 = arith.truncf %18 : vector<8x128xf32> to vector<8x128xbf16>
    %c192 = arith.constant 192 : index
    %c0_11 = arith.constant 0 : index
    %20 = vector.load %arg1[%c192, %c0_11] : memref<320x128xbf16, #tpu.memory_space<vmem>>, vector<128x128xbf16>
    %cst_12 = arith.constant dense<0.000000e+00> : vector<8x128xf32>
    %21 = tpu.matmul %19, %20, %cst_12 {dimension_numbers = #tpu.dot_dimension_numbers<[1], [0], [0], [1], [0, 0, 1, 1], [], []>} : vector<8x128xbf16>, vector<128x128xbf16>, vector<8x128xf32> -> vector<8x128xf32>
    %22 = vector.extract_strided_slice %1 {offsets = [2, 0], sizes = [1, 128], strides = [1, 1]} : vector<8x128xf32> to vector<1x128xf32>
    %23 = vector.broadcast %22 : vector<1x128xf32> to vector<8x128xf32>
    %24 = arith.addf %21, %23 : vector<8x128xf32>
    %25 = tpu.iota {dimensions = array<i32: 1>} : vector<8x128xi32>
    %c10_i32 = arith.constant 10 : i32
    %26 = vector.broadcast %c10_i32 : i32 to vector<8x128xi32>
    %27 = arith.cmpi slt, %25, %26 : vector<8x128xi32>
    %c10_i32_13 = arith.constant 10 : i32
    %28 = vector.broadcast %c10_i32_13 : i32 to vector<8x128xi32>
    %29 = arith.cmpi sge, %25, %28 : vector<8x128xi32>
    %c20_i32 = arith.constant 20 : i32
    %30 = vector.broadcast %c20_i32 : i32 to vector<8x128xi32>
    %31 = arith.cmpi slt, %25, %30 : vector<8x128xi32>
    %32 = arith.andi %29, %31 : vector<8x128xi1>
    %cst_14 = arith.constant 0xFF800000 : f32
    %33 = vector.broadcast %cst_14 : f32 to vector<8x128xf32>
    %34 = arith.select %27, %24, %33 : vector<8x128xi1>, vector<8x128xf32>
    %cst_15 = arith.constant dense<0xFF800000> : vector<8xf32>
    %35 = vector.multi_reduction <maximumf>, %34, %cst_15 [1] : vector<8x128xf32> to vector<8xf32>
    %36 = vector.shape_cast %35 : vector<8xf32> to vector<8x1xf32>
    %37 = vector.broadcast %36 : vector<8x1xf32> to vector<8x128xf32>
    %38 = arith.subf %34, %37 : vector<8x128xf32>
    %39 = math.exp %38 : vector<8x128xf32>
    %cst_16 = arith.constant dense<0.000000e+00> : vector<8xf32>
    %40 = vector.multi_reduction <add>, %39, %cst_16 [1] : vector<8x128xf32> to vector<8xf32>
    %41 = vector.shape_cast %40 : vector<8xf32> to vector<8x1xf32>
    %42 = vector.broadcast %41 : vector<8x1xf32> to vector<8x128xf32>
    %43 = arith.divf %39, %42 : vector<8x128xf32>
    %cst_17 = arith.constant 0xFF800000 : f32
    %44 = vector.broadcast %cst_17 : f32 to vector<8x128xf32>
    %45 = arith.select %32, %24, %44 : vector<8x128xi1>, vector<8x128xf32>
    %cst_18 = arith.constant dense<0xFF800000> : vector<8xf32>
    %46 = vector.multi_reduction <maximumf>, %45, %cst_18 [1] : vector<8x128xf32> to vector<8xf32>
    %47 = vector.shape_cast %46 : vector<8xf32> to vector<8x1xf32>
    %48 = vector.broadcast %47 : vector<8x1xf32> to vector<8x128xf32>
    %49 = arith.subf %45, %48 : vector<8x128xf32>
    %50 = math.exp %49 : vector<8x128xf32>
    %cst_19 = arith.constant dense<0.000000e+00> : vector<8xf32>
    %51 = vector.multi_reduction <add>, %50, %cst_19 [1] : vector<8x128xf32> to vector<8xf32>
    %52 = vector.shape_cast %51 : vector<8xf32> to vector<8x1xf32>
    %53 = vector.broadcast %52 : vector<8x1xf32> to vector<8x128xf32>
    %54 = arith.divf %50, %53 : vector<8x128xf32>
    %55 = arith.addf %43, %54 : vector<8x128xf32>
    %56 = arith.addf %24, %2 : vector<8x128xf32>
    %cst_20 = arith.constant 0xFF800000 : f32
    %57 = vector.broadcast %cst_20 : f32 to vector<8x128xf32>
    %58 = arith.select %27, %56, %57 : vector<8x128xi1>, vector<8x128xf32>
    %cst_21 = arith.constant dense<0xFF800000> : vector<8xf32>
    %59 = vector.multi_reduction <maximumf>, %58, %cst_21 [1] : vector<8x128xf32> to vector<8xf32>
    %60 = vector.shape_cast %59 : vector<8xf32> to vector<8x1xf32>
    %61 = vector.broadcast %60 : vector<8x1xf32> to vector<8x128xf32>
    %62 = arith.cmpf oge, %58, %61 : vector<8x128xf32>
    %c256_i32 = arith.constant 256 : i32
    %63 = vector.broadcast %c256_i32 : i32 to vector<8x128xi32>
    %64 = arith.select %62, %25, %63 : vector<8x128xi1>, vector<8x128xi32>
    %cst_22 = arith.constant dense<2147483647> : vector<8xi32>
    %65 = vector.multi_reduction <minsi>, %64, %cst_22 [1] : vector<8x128xi32> to vector<8xi32>
    %66 = vector.shape_cast %65 : vector<8xi32> to vector<8x1xi32>
    %cst_23 = arith.constant 0xFF800000 : f32
    %67 = vector.broadcast %cst_23 : f32 to vector<8x128xf32>
    %68 = arith.select %32, %56, %67 : vector<8x128xi1>, vector<8x128xf32>
    %cst_24 = arith.constant dense<0xFF800000> : vector<8xf32>
    %69 = vector.multi_reduction <maximumf>, %68, %cst_24 [1] : vector<8x128xf32> to vector<8xf32>
    %70 = vector.shape_cast %69 : vector<8xf32> to vector<8x1xf32>
    %71 = vector.broadcast %70 : vector<8x1xf32> to vector<8x128xf32>
    %72 = arith.cmpf oge, %68, %71 : vector<8x128xf32>
    %c256_i32_25 = arith.constant 256 : i32
    %73 = vector.broadcast %c256_i32_25 : i32 to vector<8x128xi32>
    %74 = arith.select %72, %25, %73 : vector<8x128xi1>, vector<8x128xi32>
    %cst_26 = arith.constant dense<2147483647> : vector<8xi32>
    %75 = vector.multi_reduction <minsi>, %74, %cst_26 [1] : vector<8x128xi32> to vector<8xi32>
    %76 = vector.shape_cast %75 : vector<8xi32> to vector<8x1xi32>
    %c10_i32_27 = arith.constant 10 : i32
    %77 = vector.broadcast %c10_i32_27 : i32 to vector<8x1xi32>
    %78 = arith.subi %76, %77 : vector<8x1xi32>
    %c20_i32_28 = arith.constant 20 : i32
    %79 = vector.broadcast %c20_i32_28 : i32 to vector<8x128xi32>
    %80 = arith.cmpi eq, %25, %79 : vector<8x128xi32>
    %81 = arith.sitofp %66 : vector<8x1xi32> to vector<8x1xf32>
    %c21_i32 = arith.constant 21 : i32
    %82 = vector.broadcast %c21_i32 : i32 to vector<8x128xi32>
    %83 = arith.cmpi eq, %25, %82 : vector<8x128xi32>
    %84 = arith.sitofp %78 : vector<8x1xi32> to vector<8x1xf32>
    %85 = vector.shape_cast %84 : vector<8x1xf32> to vector<8x1xf32>
    %86 = vector.broadcast %85 : vector<8x1xf32> to vector<8x128xf32>
    %87 = arith.select %83, %86, %24 : vector<8x128xi1>, vector<8x128xf32>
    %88 = vector.shape_cast %81 : vector<8x1xf32> to vector<8x1xf32>
    %89 = vector.broadcast %88 : vector<8x1xf32> to vector<8x128xf32>
    %90 = arith.select %80, %89, %87 : vector<8x128xi1>, vector<8x128xf32>
    %c0_29 = arith.constant 0 : index
    %c0_30 = arith.constant 0 : index
    %91 = vector.load %arg4[%c0_29, %c0_30] : memref<8x256xf32, #tpu.memory_space<vmem>>, vector<8x128xf32>
    tpu.vector_store %arg4[%c0_29, %c0_30], %90 {strides = array<i32>} : memref<8x256xf32, #tpu.memory_space<vmem>>, vector<8x128xf32>,
    %c0_31 = arith.constant 0 : index
    %c128 = arith.constant 128 : index
    %92 = vector.load %arg4[%c0_31, %c128] : memref<8x256xf32, #tpu.memory_space<vmem>>, vector<8x128xf32>
    tpu.vector_store %arg4[%c0_31, %c128], %55 {strides = array<i32>} : memref<8x256xf32, #tpu.memory_space<vmem>>, vector<8x128xf32>,
    return
  }
}

</mosaic_0001>

<bundles_post_ra>
// kernel: location_head.1
= control target key start
LH: loop header
LB: loop body
LE: loop exit
PB: predicated region body
PF: predicated region fallthrough
CT: control target
= control target key end

     0   :  { %9 = vsyncpa [#allocation3], 0  ;;  %s568_s15 = smov [#allocation2]   ;;  %s661_s0 = inlined_call_operand.vmem [shape: f32[8,64], index: 0, kind: input, shape index: {}]   ;;  %s662_s1 = inlined_call_operand.hbm [shape: bf16[320,128], index: 1, kind: input, shape index: {}]   ;;  %s663_s2 = inlined_call_operand.vmem [shape: f32[8,128], index: 2, kind: input, shape index: {}]   ;;  %s664_s3 = inlined_call_operand.vmem [shape: f32[8,128], index: 3, kind: input, shape index: {}]   ;;  %s665_s4 = inlined_call_operand.vmem [shape: f32[8,256], index: 4, kind: output, shape index: {}]  }
   0x1   :  { %s17_s16 = sshll.u32 %s568_s15, 4  ;;  %s18_s16 = int_to_ptr.vmem [resolvable:$true] %s17_s16 }
   0x2   :  { %s554_s17 = scalar_lea.vmem %s18_s16, 2560  ;;  %p559_p1 = scmp.lt.s32.totalorder %s18_s16, %s18_s16 }
   0x3   :  { %p555_p0 = scmp.ne.s32.totalorder %s18_s16, %s554_s17  ;;  %p560_p2 = scmp.lt.s32.totalorder %s554_s17, %s554_s17 }
   0x5   :  { %p561_p3 = por %p560_p2, %p559_p1 }
   0x7   :  { %p562_p4 = pnand %p561_p3, %p555_p0 }
   0x9   :  { %565 = shalt.err (!%p562_p4)
}
   0xa   :  { %s569_s18 = smov 64   ;;  %s570_s19 = smov 4  }
   0xb   :  { %23 = dma.hbm_to_vmem [thread:$0]  %s662_s1, 2560, %s18_s16, [#allocation3], %s569_s18, %s569_s18, %s570_s19  }
   0xc   :  { %566 = dma.done.wait [#allocation3], 2560  }
   0xd   :  { %567 = vsyncadd [#allocation3], 4294964736  ;;  %v571_v0 = vmov 0.0   ;;  %vm572_vm0 = vmmov 0   ;;  %v518_v1 = vld [vmem:[#allocation2 + $0x18] sm:$0xff]   ;;  %v519_v2 = vld [vmem:[#allocation2 + $0x10] sm:$0xff]   ;;  %v44_v21 = vlaneseq }
   0xe   :  { %461 = vmatprep.subr.bf16.mxu0 %v571_v0  ;;  %469 = vmatprep.mubr.msk.bf16.mxu0 %vm572_vm0, %v571_v0  ;;  %v522_v3 = vld [vmem:[#allocation2 + $0x58] sm:$0xff]   ;;  %v520_v4 = vld [vmem:[#allocation2 + $0x8] sm:$0xff]   ;;  %v523_v5 = vld [vmem:[#allocation2 + $0x50] sm:$0xff]   ;;  %vm72_vm1 = vcmask 523264  }
   0xf   :  { %473 = vmatprep.subr.bf16.mxu1 %v571_v0  ;;  %489 = vmatprep.mubr.msk.bf16.mxu1 %vm572_vm0, %v571_v0  ;;  %v521_v6 = vld [vmem:[#allocation2] sm:$0xff]   ;;  %v524_v8 = vld [vmem:[#allocation2 + $0x48] sm:$0xff]   ;;  %v526_v11 = vld [vmem:[#allocation2 + $0x38] sm:$0xff]   ;;  %v45_v22 = vshrl.u32 %v44_v21, 7  ;;  %v633_v45 = vand.u32 127, %v44_v21 }
  0x10   :  { %462 = vmatpush3.bf16.msra.mxu0 %v518_v1  ;;  %474 = vmatpush3.bf16.msra.mxu1 %v522_v3  ;;  %v32_v7 = vld [vmem:[%s661_s0] sm:$0xff]  ;;  %v527_v12 = vld [vmem:[#allocation2 + $0x30] sm:$0xff]   ;;  %v528_v13 = vld [vmem:[#allocation2 + $0x28] sm:$0xff]  }
  0x11   :  { %463 = vmatprep.subr.bf16.mxu0 %v571_v0  ;;  %475 = vmatprep.subr.bf16.mxu1 %v571_v0  ;;  %v35_v9 = vpack.c.bf16 %v32_v7, %v32_v7  ;;  %v525_v10 = vld [vmem:[#allocation2 + $0x40] sm:$0xff]   ;;  %v530_v15 = vld [vmem:[#allocation2 + $0x98] sm:$0xff]   ;;  %v531_v16 = vld [vmem:[#allocation2 + $0x90] sm:$0xff]   ;;  %v46_v23 = vsub.s32 0, %v45_v22  ;;  %v136_v35 = vsub.s32 1, %v45_v22  ;;  %v246_v44 = vsub.s32 2, %v45_v22 }
  0x12   :  { %v529_v14 = vld [vmem:[#allocation2 + $0x20] sm:$0xff]   ;;  %v532_v17 = vld [vmem:[#allocation2 + $0x88] sm:$0xff]   ;;  %v534_v19 = vld [vmem:[#allocation2 + $0x78] sm:$0xff]   ;;  %vm338_vm2 = vcmp.lt.s32.totalorder %v633_v45, 10  ;;  %vm339_vm3 = vcmp.ge.s32.totalorder %v633_v45, 10  ;;  %vm340_vm4 = vcmp.lt.s32.totalorder %v633_v45, 20 }
  0x13   :  { %v533_v18 = vld [vmem:[#allocation2 + $0x80] sm:$0xff]   ;;  %v535_v20 = vld [vmem:[#allocation2 + $0x70] sm:$0xff]   ;;  %v536_v33 = vld [vmem:[#allocation2 + $0x68] sm:$0xff]   ;;  %vm405_vm10 = vcmp.eq.s32.totalorder %v633_v45, 21  ;;  %vm403_vm11 = vcmp.eq.s32.totalorder %v633_v45, 20 }
  0x14   :  { %464 = vmatpush3.bf16.msra.mxu0 %v519_v2  ;;  %476 = vmatpush3.bf16.msra.mxu1 %v523_v5  ;;  %v33_v24 = vld [vmem:[%s663_s2] sm:$0xff]  ;;  %vm341_vm5 = vmand %vm339_vm3, %vm340_vm4 }
  0x15   :  { %465 = vmatprep.subr.bf16.mxu0 %v571_v0  ;;  %477 = vmatprep.subr.bf16.mxu1 %v571_v0  ;;  %v47_v25 = vrot.slane %v33_v24, %v46_v23  ;;  %v537_v34 = vld [vmem:[#allocation2 + $0x60] sm:$0xff]   ;;  %v137_v36 = vrot.slane %v33_v24, %v136_v35  ;;  %v247_v46 = vrot.slane %v33_v24, %v246_v44 }
  0x16   :  { %v34_v48 = vld [vmem:[%s664_s3] sm:$0xff] }
  0x18   :  { %466 = vmatpush3.bf16.msra.mxu0 %v520_v4  ;;  %478 = vmatpush3.bf16.msra.mxu1 %v524_v8 }
  0x19   :  { %467 = vmatprep.subr.bf16.mxu0 %v571_v0  ;;  %479 = vmatprep.subr.bf16.mxu1 %v571_v0 }
  0x1c   :  { %468 = vmatpush3.bf16.msra.mxu0 %v521_v6  ;;  %480 = vmatpush3.bf16.msra.mxu1 %v525_v10 }
  0x1d   :  { %493 = vmatprep.subr.bf16.mxu0 %v571_v0  ;;  %481 = vmatprep.subr.bf16.mxu1 %v571_v0 }
  0x1f   :  { %470 = vmatmul.mubr.msk.bf16.vlgmr.msra.gmra.mxu0 %vm72_vm1, %v35_v9 }
  0x20   :  { %509 = vmatprep.mubr.msk.bf16.mxu0 %vm572_vm0, %v571_v0  ;;  %482 = vmatpush3.bf16.msra.mxu1 %v526_v11 }
  0x21   :  { %483 = vmatprep.subr.bf16.mxu1 %v571_v0  ;;  %494 = vmatpush3.bf16.msra.mxu0 %v530_v15 }
  0x22   :  { %495 = vmatprep.subr.bf16.mxu0 %v571_v0 }
  0x24   :  { %484 = vmatpush3.bf16.msra.mxu1 %v527_v12 }
  0x25   :  { %485 = vmatprep.subr.bf16.mxu1 %v571_v0  ;;  %496 = vmatpush3.bf16.msra.mxu0 %v531_v16 }
  0x26   :  { %497 = vmatprep.subr.bf16.mxu0 %v571_v0 }
  0x28   :  { %486 = vmatpush3.bf16.msra.mxu1 %v528_v13 }
  0x29   :  { %487 = vmatprep.subr.bf16.mxu1 %v571_v0  ;;  %498 = vmatpush3.bf16.msra.mxu0 %v532_v17 }
  0x2a   :  { %499 = vmatprep.subr.bf16.mxu0 %v571_v0 }
  0x2c   :  { %488 = vmatpush3.bf16.msra.mxu1 %v529_v14 }
  0x2d   :  { %500 = vmatpush3.bf16.msra.mxu0 %v533_v18 }
  0x2e   :  { %501 = vmatprep.subr.bf16.mxu0 %v571_v0 }
  0x31   :  { %502 = vmatpush3.bf16.msra.mxu0 %v534_v19 }
  0x32   :  { %503 = vmatprep.subr.bf16.mxu0 %v571_v0 }
  0x35   :  { %504 = vmatpush3.bf16.msra.mxu0 %v535_v20 }
  0x36   :  { %505 = vmatprep.subr.bf16.mxu0 %v571_v0 }
  0x39   :  { %506 = vmatpush3.bf16.msra.mxu0 %v536_v33 }
  0x3a   :  { %507 = vmatprep.subr.bf16.mxu0 %v571_v0 }
  0x3d   :  { %508 = vmatpush3.bf16.msra.mxu0 %v537_v34 }
  0xdf   :  { %v110_v26 = vpop.f32.mrf.mxu0 }
  0xe0   :  { %v111_v27 = vadd.f32 %v110_v26, %v47_v25 }
  0xe1   :  { %v471_v28 = vpop.f32.mrf.mxu0 }
  0xe2   :  { %v116_v29 = vmax.f32 %v111_v27, 0.0 }
  0xe3   :  { %v113_v30 = vpop.f32.mrf.mxu0 }
  0xe4   :  { %v117_v31 = vpack.c.bf16 %v116_v29, %v116_v29 }
  0xe5   :  { %v472_v32 = vpop.f32.mrf.mxu0 }
  0xe6   :  { %490 = vmatmul.mubr.bf16.vlgmr.msra.gmra.mxu1 %v117_v31 }
 0x1a6   :  { %v220_v37 = vpop.f32.mrf.mxu1 }
 0x1a7   :  { %v221_v38 = vadd.f32 %v220_v37, %v137_v36 }
 0x1a8   :  { %v491_v39 = vpop.f32.mrf.mxu1 }
 0x1a9   :  { %v226_v40 = vmax.f32 %v221_v38, 0.0 }
 0x1aa   :  { %v223_v41 = vpop.f32.mrf.mxu1 }
 0x1ab   :  { %v227_v42 = vpack.c.bf16 %v226_v40, %v226_v40 }
 0x1ac   :  { %v492_v43 = vpop.f32.mrf.mxu1 }
 0x1ad   :  { %510 = vmatmul.mubr.bf16.vlgmr.msra.gmra.mxu0 %v227_v42 }
 0x26d   :  { %v330_v47 = vpop.f32.mrf.mxu0 }
 0x26e   :  { %v639_v49 = vadd.f32 %v330_v47, %v247_v46 }
 0x26f   :  { %v511_v50 = vpop.f32.mrf.mxu0 }
 0x270   :  { %v342_v51 = vsel %vm338_vm2, %v639_v49, -inf  ;;  %v363_v52 = vadd.f32 %v639_v49, %v34_v48  ;;  %v352_v56 = vsel %vm341_vm5, %v639_v49, -inf }
 0x271   :  { %343 = vmax.xlane.f32.xlu1 %v342_v51  ;;  %v333_v53 = vpop.f32.mrf.mxu0 }
 0x272   :  { %v383_v54 = vsel %vm341_vm5, %v363_v52, -inf  ;;  %v364_v57 = vsel %vm338_vm2, %v363_v52, -inf }
 0x273   :  { %384 = vmax.xlane.f32.xlu0 %v383_v54  ;;  %v512_v55 = vpop.f32.mrf.mxu0 }
 0x275   :  { %353 = vmax.xlane.f32.xlu1 %v352_v56 }
 0x277   :  { %365 = vmax.xlane.f32.xlu0 %v364_v57 }
 0x2fa   :  { %v344_v58 = vpop.xlane.xlu1 %343 }
 0x2fb   :  { %v345_v59 = vsub.f32 %v342_v51, %v344_v58 }
 0x2fc   :  { %v385_v60 = vpop.xlane.xlu0 %384 }
 0x2fd   :  { %v346_v61 = vmul.f32 1.442695, %v345_v59  ;;  %vm386_vm6 = vcmp.ge.f32.partialorder %v383_v54, %v385_v60 }
 0x2fe   :  { %v387_v62 = vsel %vm386_vm6, %v633_v45, 256  ;;  %v354_v63 = vpop.xlane.xlu1 %353 }
 0x2ff   :  { %538 = vpow2.f32 %v346_v61  ;;  %v355_v0 = vsub.f32 %v352_v56, %v354_v63  ;;  %v389_v1 = vshra.s32 %v387_v62, 16  ;;  %v388_v10 = vand.u32 65535, %v387_v62 }
 0x300   :  { %v366_v2 = vpop.xlane.xlu0 %365 }
 0x301   :  { %v356_v3 = vmul.f32 1.442695, %v355_v0  ;;  %vm367_vm7 = vcmp.ge.f32.partialorder %v364_v57, %v366_v2  ;;  %v391_v4 = vcvt.s32.f32 %v389_v1  ;;  %v390_v13 = vcvt.s32.f32 %v388_v10 }
 0x302   :  { %v368_v5 = vsel %vm367_vm7, %v633_v45, 256 }
 0x303   :  { %540 = vpow2.f32 %v356_v3  ;;  %392 = vmin.xlane.f32.xlu0 %v391_v4  ;;  %v370_v6 = vshra.s32 %v368_v5, 16  ;;  %v369_v11 = vand.u32 65535, %v368_v5 }
 0x305   :  { %v372_v7 = vcvt.s32.f32 %v370_v6  ;;  %v371_v16 = vcvt.s32.f32 %v369_v11 }
 0x307   :  { %373 = vmin.xlane.f32.xlu1 %v372_v7 }
 0x30c   :  { %v539_v8 = vpop.eup %538 }
 0x30d   :  { %348 = vadd.xlane.f32.xlu0 %v539_v8 }
 0x310   :  { %v541_v9 = vpop.eup %540 }
 0x311   :  { %358 = vadd.xlane.f32.xlu1 %v541_v9 }
 0x38c   :  { %v393_v12 = vpop.xlane.xlu0 %392 }
 0x38d   :  { %vm394_vm8 = vcmp.eq.f32.partialorder %v391_v4, %v393_v12  ;;  %v399_v25 = vcvt.f32.s32 %v393_v12 }
 0x38e   :  { %v395_v14 = vsel %vm394_vm8, %v390_v13, inf }
 0x38f   :  { %396 = vmin.xlane.f32.xlu0 %v395_v14  ;;  %v400_v27 = vshll.u32 %v399_v25, 16 }
 0x390   :  { %v374_v15 = vpop.xlane.xlu1 %373 }
 0x391   :  { %vm375_vm9 = vcmp.eq.f32.partialorder %v372_v7, %v374_v15  ;;  %v380_v28 = vcvt.f32.s32 %v374_v15 }
 0x392   :  { %v376_v17 = vsel %vm375_vm9, %v371_v16, inf }
 0x393   :  { %377 = vmin.xlane.f32.xlu1 %v376_v17  ;;  %v381_v32 = vshll.u32 %v380_v28, 16 }
 0x396   :  { %v349_v18 = vpop.xlane.xlu0 %348 }
 0x397   :  { %542 = vrcp.f32 %v349_v18 }
 0x39a   :  { %v359_v19 = vpop.xlane.xlu1 %358 }
 0x39b   :  { %544 = vrcp.f32 %v359_v19 }
 0x3a4   :  { %v543_v20 = vpop.eup %542 }
 0x3a5   :  { %v351_v22 = vmul.f32 %v543_v20, %v539_v8 }
 0x3a8   :  { %v545_v21 = vpop.eup %544 }
 0x3a9   :  { %v361_v23 = vmul.f32 %v545_v21, %v541_v9 }
 0x3ab   :  { %v362_v24 = vadd.f32 %v361_v23, %v351_v22 }
 0x3ad   :  { %410 = vst [vmem:[%s665_s4 + $0x8] sm:$0xff] %v362_v24 }
 0x418   :  { %v397_v26 = vpop.xlane.xlu0 %396 }
 0x419   :  { %v398_v29 = vcvt.f32.s32 %v397_v26 }
 0x41b   :  { %v401_v30 = vadd.s32 %v400_v27, %v398_v29 }
 0x41c   :  { %v378_v31 = vpop.xlane.xlu1 %377 }
 0x41d   :  { %v437_v33 = vadd.s32 4294967286, %v401_v30  ;;  %v379_v34 = vcvt.f32.s32 %v378_v31 }
 0x41f   :  { %v406_v35 = vcvt.s32.f32 %v437_v33  ;;  %v382_v36 = vadd.s32 %v381_v32, %v379_v34 }
 0x421   :  { %v407_v37 = vsel %vm405_vm10, %v406_v35, %v639_v49  ;;  %v404_v38 = vcvt.s32.f32 %v382_v36 }
 0x423   :  { %v408_v39 = vsel %vm403_vm11, %v404_v38, %v407_v37 }
 0x424   :  { %409 = vst [vmem:[%s665_s4] sm:$0xff] %v408_v39 }
 0x425   :  { %415 = vsyncpa [#allocation3], 1 }

</bundles_post_ra>
